<compile_context>
chip_gen: v5e
topology: v5e:2x2
jax: 0.10.0
libtpu: 0.0.40
codegen_flags: <defaults>
</compile_context>

<pallas_src>
import jax
import jax.numpy as jnp
import numpy as np
from jax.experimental import pallas as pl
from jax.experimental.pallas import tpu as pltpu

C_IN, C_OUT, K, STRIDE = 3, 7, 5, 3
KKC = K * K * C_IN                       # 75
KKC_PAD = ((KKC + 7) // 8) * 8           # 80: sublane-aligned contraction dim


def _convt_tanh_kernel(w_ref, xs_ref, b_ref, o_ref):
    """Single fused matmul + bias + tanh.

    w_ref  : (Cout, KKC_PAD)   effective (flipped) weights, zero-padded cols
    xs_ref : (KKC_PAD, tm)     lane-dense im2col slab tile, zero-padded rows
    b_ref  : (Cout, 1)         bias
    o_ref  : (Cout, tm)        lane-dense output tile
    """
    acc = jnp.dot(w_ref[...], xs_ref[...], preferred_element_type=jnp.float32)
    o_ref[...] = jnp.tanh(acc + b_ref[...]).astype(o_ref.dtype)


def _num_tensorcores() -> int:
    """Best-effort TensorCore count per chip (v7x=2, v5e/v6e=1). Defaults to 1."""
    try:
        info = pltpu.get_tpu_info()
        for name in ("num_cores", "core_count", "num_tensorcores",
                     "tensorcore_count", "cores_per_chip"):
            n = getattr(info, name, None)
            if isinstance(n, int) and n > 0:
                return n
    except Exception:
        pass
    try:
        if "v7" in jax.devices()[0].device_kind.lower():
            return 2
    except Exception:
        pass
    return 1


@jax.jit
def conv_transpose_tanh(x_nchw, weight, bias):
    """weight: (C_in, C_out, K, K) PyTorch ConvTranspose2d layout. bias: (C_out,)."""
    N, Ci, H, W = x_nchw.shape
    Co = weight.shape[1]
    Ho = (H - 1) * STRIDE + K
    Wo = (W - 1) * STRIDE + K
    M = N * Ho * Wo

    x_f = x_nchw.astype(jnp.float32)

    # ---- im2col in ONE XLA op: one-hot patch-extraction convolution ----------
    # E[f, c, kh, kw] = 1  iff  f == (kh*K + kw)*Ci + c   (slab row order (kh,kw,c))
    ext = jnp.eye(KKC, dtype=jnp.float32).reshape(KKC, K, K, Ci)
    ext = jnp.transpose(ext, (0, 3, 1, 2))                     # (KKC, Ci, K, K) OIHW
    # lhs_dilation=STRIDE + (K-1) edge padding == zero-upsample + implicit pad of
    # the transposed conv; "CNHW" output gives the (KKC, N, Ho, Wo) slab directly.
    patches = jax.lax.conv_general_dilated(
        x_f, ext,
        window_strides=(1, 1),
        padding=((K - 1, K - 1), (K - 1, K - 1)),
        lhs_dilation=(STRIDE, STRIDE),
        dimension_numbers=("NCHW", "OIHW", "CNHW"),
    )                                                          # (KKC, N, Ho, Wo)
    xs_T = patches.reshape(KKC, M)                             # columns = (n, oh, ow)

    # effective (spatially flipped) weights, columns ordered (kh, kw, c)
    w_eff = jnp.transpose(weight[:, :, ::-1, ::-1], (2, 3, 0, 1))   # (K, K, Ci, Co)
    w_T = w_eff.reshape(KKC, Co).T.astype(jnp.float32)              # (Co, KKC)
    b2 = bias.reshape(Co, 1).astype(jnp.float32)

    # ---- tiling: 1 grid step on 1-TC chips, 2 balanced steps on v7x ----------
    num_tiles = 2 if (_num_tensorcores() >= 2 and M > 128) else 1
    tm = ((pl.cdiv(M, num_tiles) + 127) // 128) * 128
    Mp = num_tiles * tm

    # zero-pad contraction dim (75 -> 80) and the M tail (padded cols sliced off)
    pad_r, pad_c = KKC_PAD - KKC, Mp - M
    if pad_r or pad_c:
        xs_T = jnp.pad(xs_T, ((0, pad_r), (0, pad_c)))
    if pad_r:
        w_T = jnp.pad(w_T, ((0, 0), (0, pad_r)))

    cost = pl.CostEstimate(
        flops=2 * Co * KKC_PAD * Mp,
        transcendentals=Co * Mp,
        bytes_accessed=4 * (KKC_PAD * Mp + Co * Mp + Co * KKC_PAD + Co),
    )

    out_t = pl.pallas_call(
        _convt_tanh_kernel,
        out_shape=jax.ShapeDtypeStruct((Co, Mp), jnp.float32),
        grid_spec=pltpu.PrefetchScalarGridSpec(
            num_scalar_prefetch=0,
            grid=(num_tiles,),
            in_specs=[
                pl.BlockSpec((Co, KKC_PAD), lambda i: (0, 0)),
                pl.BlockSpec((KKC_PAD, tm), lambda i: (0, i)),
                pl.BlockSpec((Co, 1), lambda i: (0, 0)),
            ],
            out_specs=pl.BlockSpec((Co, tm), lambda i: (0, i)),
        ),
        compiler_params=pltpu.CompilerParams(
            dimension_semantics=("parallel",)),
        cost_estimate=cost,
    )(w_T, xs_T, b2)

    # (Co, M) -> (N, Co, Ho, Wo)
    out = out_t[:, :M].reshape(Co, N, Ho, Wo)
    return jnp.transpose(out, (1, 0, 2, 3))


def _reference(x_nchw, weight, bias):
    # conv_transpose == dilated conv with flipped/transposed kernel
    w_conv = jnp.transpose(weight[:, :, ::-1, ::-1], (1, 0, 2, 3))  # (Co, Ci, K, K)
    y = jax.lax.conv_general_dilated(
        x_nchw, w_conv,
        window_strides=(1, 1),
        padding=((K - 1, K - 1), (K - 1, K - 1)),
        lhs_dilation=(STRIDE, STRIDE),
        dimension_numbers=("NCHW", "OIHW", "NCHW"),
    )
    return jnp.tanh(y + bias.reshape(1, -1, 1, 1))


if __name__ == "__main__":
    key = jax.random.PRNGKey(0)
    kx, kw, kb = jax.random.split(key, 3)

    # small input consistent with ConvTranspose2d(3, 7, 5, stride=3): (N=2, C=3, 8, 8)
    x = jax.random.normal(kx, (2, C_IN, 8, 8), dtype=jnp.float32)
    # deterministic synthetic parameters (PyTorch weight layout: (Cin, Cout, K, K))
    weight = 0.1 * jax.random.normal(kw, (C_IN, C_OUT, K, K), dtype=jnp.float32)
    bias = 0.1 * jax.random.normal(kb, (C_OUT,), dtype=jnp.float32)

    out = conv_transpose_tanh(x, weight, bias)
    out = jax.block_until_ready(out)

    ref = jax.block_until_ready(_reference(x, weight, bias))
    assert out.shape == (2, C_OUT, 26, 26), out.shape
    np.testing.assert_allclose(np.asarray(out), np.asarray(ref), rtol=1e-5, atol=1e-5)

    print("KERNEL_OK")
</pallas_src>

<mosaic_0001>
module attributes {stable_mosaic.version = 11 : i64} {
  func.func @_convt_tanh_kernel(%arg0: i32, %arg1: memref<7x80xf32, #tpu.memory_space<vmem>>, %arg2: memref<80x1408xf32, #tpu.memory_space<vmem>>, %arg3: memref<7x1xf32, #tpu.memory_space<vmem>>, %arg4: memref<7x1408xf32, #tpu.memory_space<vmem>>) attributes {dimension_semantics = [#tpu.dimension_semantics<parallel>], iteration_bounds = array<i64: 1>, scalar_prefetch = 0 : i64, scratch_operands = 0 : i64, tpu.core_type = #tpu.core_type<tc>, window_params = [{pipeline_mode = #tpu.pipeline_mode<synchronous>, transform_indices = @transform_0, window_bounds = array<i64: 7, 80>}, {transform_indices = @transform_1, window_bounds = array<i64: 80, 1408>}, {pipeline_mode = #tpu.pipeline_mode<synchronous>, transform_indices = @transform_2, window_bounds = array<i64: 7, 1>}, {transform_indices = @transform_3, window_bounds = array<i64: 7, 1408>}]} {
    %c0 = arith.constant 0 : index
    %c0_0 = arith.constant 0 : index
    %0 = vector.load %arg1[%c0, %c0_0] : memref<7x80xf32, #tpu.memory_space<vmem>>, vector<7x80xf32>
    %c0_1 = arith.constant 0 : index
    %c0_2 = arith.constant 0 : index
    %1 = vector.load %arg2[%c0_1, %c0_2] : memref<80x1408xf32, #tpu.memory_space<vmem>>, vector<80x1408xf32>
    %cst = arith.constant dense<0.000000e+00> : vector<7x1408xf32>
    %2 = tpu.matmul %0, %1, %cst {dimension_numbers = #tpu.dot_dimension_numbers<[1], [0], [0], [1], [0, 0, 1, 1], [], []>} : vector<7x80xf32>, vector<80x1408xf32>, vector<7x1408xf32> -> vector<7x1408xf32>
    %c0_3 = arith.constant 0 : index
    %c0_4 = arith.constant 0 : index
    %3 = vector.load %arg3[%c0_3, %c0_4] : memref<7x1xf32, #tpu.memory_space<vmem>>, vector<7x1xf32>
    %4 = vector.broadcast %3 : vector<7x1xf32> to vector<7x1408xf32>
    %5 = arith.addf %2, %4 : vector<7x1408xf32>
    %6 = math.tanh %5 : vector<7x1408xf32>
    %c0_5 = arith.constant 0 : index
    %c0_6 = arith.constant 0 : index
    %7 = vector.load %arg4[%c0_5, %c0_6] : memref<7x1408xf32, #tpu.memory_space<vmem>>, vector<7x1408xf32>
    tpu.vector_store %arg4[%c0_5, %c0_6], %6 {strides = array<i32>} : memref<7x1408xf32, #tpu.memory_space<vmem>>, vector<7x1408xf32>,
    return
  }
  func.func @transform_0(%arg0: i32) -> (i32, i32) {
    %c0_i32 = arith.constant 0 : i32
    %c0_i32_0 = arith.constant 0 : i32
    %c0_i32_1 = arith.constant 0 : i32
    return %c0_i32, %c0_i32_0 : i32, i32
  }
  func.func @transform_1(%arg0: i32) -> (i32, i32) {
    %c0_i32 = arith.constant 0 : i32
    %c0_i32_0 = arith.constant 0 : i32
    return %c0_i32, %arg0 : i32, i32
  }
  func.func @transform_2(%arg0: i32) -> (i32, i32) {
    %c0_i32 = arith.constant 0 : i32
    %c0_i32_0 = arith.constant 0 : i32
    %c0_i32_1 = arith.constant 0 : i32
    return %c0_i32, %c0_i32_0 : i32, i32
  }
  func.func @transform_3(%arg0: i32) -> (i32, i32) {
    %c0_i32 = arith.constant 0 : i32
    %c0_i32_0 = arith.constant 0 : i32
    return %c0_i32, %arg0 : i32, i32
  }
}

</mosaic_0001>

<bundles_post_ra>
// kernel: conv_transpose_tanh.1
= control target key start
LH: loop header
LB: loop body
LE: loop exit
PB: predicated region body
PF: predicated region fallthrough
CT: control target
= control target key end

     0   :  { %vm131_vm0 = vcmask 654336   ;;  %s830_s1 = inlined_call_operand.vmem [shape: f32[80,1408], index: 1, kind: input, shape index: {}]   ;;  %s831_s0 = inlined_call_operand.vmem [shape: f32[7,80], index: 0, kind: input, shape index: {}]   ;;  %s832_s2 = inlined_call_operand.vmem [shape: f32[7,1], index: 2, kind: input, shape index: {}]   ;;  %s833_s3 = inlined_call_operand.vmem [shape: f32[7,1408], index: 3, kind: output, shape index: {}]  }
   0x1   :  { %v116_v0 = vld [vmem:[%s830_s1 + $0x328] sm:$0xff]  ;;  %v105_v1 = vld [vmem:[%s830_s1 + $0x2d0] sm:$0xff]  ;;  %v114_v2 = vld [vmem:[%s830_s1 + $0x318] sm:$0xff] }
   0x2   :  { %181 = vmatpush.msra.mxu2 %v116_v0  ;;  %v115_v3 = vld [vmem:[%s830_s1 + $0x320] sm:$0xff]  ;;  %v94_v4 = vld [vmem:[%s830_s1 + $0x278] sm:$0xff]  ;;  %141 = vmatpush.msra.mxu0 %v114_v2  ;;  %v104_v6 = vld [vmem:[%s830_s1 + $0x2c8] sm:$0xff] }
   0x3   :  { %161 = vmatpush.msra.mxu1 %v115_v3  ;;  %v103_v5 = vld [vmem:[%s830_s1 + $0x2c0] sm:$0xff]  ;;  %v92_v7 = vld [vmem:[%s830_s1 + $0x268] sm:$0xff]  ;;  %v93_v8 = vld [vmem:[%s830_s1 + $0x270] sm:$0xff] }
   0x4   :  { %182 = vmatpush.msra.mxu2 %v105_v1  ;;  %v83_v9 = vld [vmem:[%s830_s1 + $0x220] sm:$0xff]  ;;  %142 = vmatpush.msra.mxu0 %v103_v5  ;;  %v81_v10 = vld [vmem:[%s830_s1 + $0x210] sm:$0xff]  ;;  %v82_v11 = vld [vmem:[%s830_s1 + $0x218] sm:$0xff] }
   0x5   :  { %162 = vmatpush.msra.mxu1 %v104_v6  ;;  %v72_v12 = vld [vmem:[%s830_s1 + $0x1c8] sm:$0xff]  ;;  %v70_v13 = vld [vmem:[%s830_s1 + $0x1b8] sm:$0xff]  ;;  %v71_v14 = vld [vmem:[%s830_s1 + $0x1c0] sm:$0xff] }
   0x6   :  { %183 = vmatpush.msra.mxu2 %v94_v4  ;;  %143 = vmatpush.msra.mxu0 %v92_v7  ;;  %v61_v15 = vld [vmem:[%s830_s1 + $0x170] sm:$0xff]  ;;  %v59_v17 = vld [vmem:[%s830_s1 + $0x160] sm:$0xff]  ;;  %v60_v18 = vld [vmem:[%s830_s1 + $0x168] sm:$0xff] }
   0x7   :  { %163 = vmatpush.msra.mxu1 %v93_v8  ;;  %v117_v16 = vld [vmem:[%s830_s1 + $0x330] sm:$0xff]  ;;  %v106_v19 = vld [vmem:[%s830_s1 + $0x2d8] sm:$0xff]  ;;  %v95_v21 = vld [vmem:[%s830_s1 + $0x280] sm:$0xff] }
   0x8   :  { %184 = vmatpush.msra.mxu2 %v83_v9  ;;  %144 = vmatpush.msra.mxu0 %v81_v10  ;;  %v50_v20 = vld [vmem:[%s830_s1 + $0x118] sm:$0xff]  ;;  %v48_v22 = vld [vmem:[%s830_s1 + $0x108] sm:$0xff]  ;;  %v49_v23 = vld [vmem:[%s830_s1 + $0x110] sm:$0xff] }
   0x9   :  { %164 = vmatpush.msra.mxu1 %v82_v11  ;;  %201 = vmatpush.msra.mxu3 %v117_v16  ;;  %v39_v24 = vld [vmem:[%s830_s1 + $0xc0] sm:$0xff]  ;;  %v84_v25 = vld [vmem:[%s830_s1 + $0x228] sm:$0xff]  ;;  %v37_v26 = vld [vmem:[%s830_s1 + $0xb0] sm:$0xff] }
   0xa   :  { %185 = vmatpush.msra.mxu2 %v72_v12  ;;  %145 = vmatpush.msra.mxu0 %v70_v13  ;;  %v38_v27 = vld [vmem:[%s830_s1 + $0xb8] sm:$0xff]  ;;  %v28_v28 = vld [vmem:[%s830_s1 + $0x68] sm:$0xff]  ;;  %v73_v29 = vld [vmem:[%s830_s1 + $0x1d0] sm:$0xff] }
   0xb   :  { %165 = vmatpush.msra.mxu1 %v71_v14  ;;  %202 = vmatpush.msra.mxu3 %v106_v19  ;;  %v26_v30 = vld [vmem:[%s830_s1 + $0x58] sm:$0xff]  ;;  %v27_v31 = vld [vmem:[%s830_s1 + $0x60] sm:$0xff]  ;;  %v17_v32 = vld [vmem:[%s830_s1 + $0x10] sm:$0xff] }
   0xc   :  { %186 = vmatpush.msra.mxu2 %v61_v15  ;;  %146 = vmatpush.msra.mxu0 %v59_v17  ;;  %v62_v33 = vld [vmem:[%s830_s1 + $0x178] sm:$0xff]  ;;  %v120_v34 = vld [vmem:[%s830_s1 + $0x348] sm:$0xff]  ;;  %v15_v35 = vld [vmem:[%s830_s1] sm:$0xff] }
   0xd   :  { %166 = vmatpush.msra.mxu1 %v60_v18  ;;  %203 = vmatpush.msra.mxu3 %v95_v21  ;;  %v16_v36 = vld [vmem:[%s830_s1 + $0x8] sm:$0xff]  ;;  %v118_v37 = vld [vmem:[%s830_s1 + $0x338] sm:$0xff]  ;;  %v109_v38 = vld [vmem:[%s830_s1 + $0x2f0] sm:$0xff] }
   0xe   :  { %187 = vmatpush.msra.mxu2 %v50_v20  ;;  %147 = vmatpush.msra.mxu0 %v48_v22  ;;  %v119_v39 = vld [vmem:[%s830_s1 + $0x340] sm:$0xff]  ;;  %v98_v42 = vld [vmem:[%s830_s1 + $0x298] sm:$0xff]  ;;  %v108_v43 = vld [vmem:[%s830_s1 + $0x2e8] sm:$0xff] }
   0xf   :  { %167 = vmatpush.msra.mxu1 %v49_v23  ;;  %204 = vmatpush.msra.mxu3 %v84_v25  ;;  %v107_v40 = vld [vmem:[%s830_s1 + $0x2e0] sm:$0xff]  ;;  %v96_v44 = vld [vmem:[%s830_s1 + $0x288] sm:$0xff]  ;;  %v97_v47 = vld [vmem:[%s830_s1 + $0x290] sm:$0xff] }
  0x10   :  { %188 = vmatpush.msra.mxu2 %v39_v24  ;;  %148 = vmatpush.msra.mxu0 %v37_v26  ;;  %v51_v41 = vld [vmem:[%s830_s1 + $0x120] sm:$0xff]  ;;  %v40_v45 = vld [vmem:[%s830_s1 + $0xc8] sm:$0xff]  ;;  %v85_v48 = vld [vmem:[%s830_s1 + $0x230] sm:$0xff] }
  0x11   :  { %168 = vmatpush.msra.mxu1 %v38_v27  ;;  %205 = vmatpush.msra.mxu3 %v73_v29  ;;  %v87_v46 = vld [vmem:[%s830_s1 + $0x240] sm:$0xff]  ;;  %v29_v49 = vld [vmem:[%s830_s1 + $0x70] sm:$0xff]  ;;  %v76_v50 = vld [vmem:[%s830_s1 + $0x1e8] sm:$0xff] }
  0x12   :  { %189 = vmatpush.msra.mxu2 %v28_v28  ;;  %149 = vmatpush.msra.mxu0 %v26_v30  ;;  %v86_v51 = vld [vmem:[%s830_s1 + $0x238] sm:$0xff]  ;;  %v65_v54 = vld [vmem:[%s830_s1 + $0x190] sm:$0xff]  ;;  %v75_v55 = vld [vmem:[%s830_s1 + $0x1e0] sm:$0xff] }
  0x13   :  { %169 = vmatpush.msra.mxu1 %v27_v31  ;;  %206 = vmatpush.msra.mxu3 %v62_v33  ;;  %v74_v52 = vld [vmem:[%s830_s1 + $0x1d8] sm:$0xff]  ;;  %v63_v56 = vld [vmem:[%s830_s1 + $0x180] sm:$0xff]  ;;  %v64_v59 = vld [vmem:[%s830_s1 + $0x188] sm:$0xff] }
  0x14   :  { %190 = vmatpush.msra.mxu2 %v17_v32  ;;  %150 = vmatpush.msra.mxu0 %v15_v35  ;;  %v18_v53 = vld [vmem:[%s830_s1 + $0x18] sm:$0xff]  ;;  %v611_v57 = vld [vmem:[%s831_s0] sm:$0x7f]  ;;  %v52_v60 = vld [vmem:[%s830_s1 + $0x128] sm:$0xff] }
  0x15   :  { %170 = vmatpush.msra.mxu1 %v16_v36  ;;  %207 = vmatpush.msra.mxu3 %v51_v41  ;;  %v54_v58 = vld [vmem:[%s830_s1 + $0x138] sm:$0xff]  ;;  %v121_v61 = vld [vmem:[%s830_s1 + $0x350] sm:$0xff]  ;;  %v43_v62 = vld [vmem:[%s830_s1 + $0xe0] sm:$0xff] }
  0x16   :  { %261 = vmatpush.msrb.mxu2 %v120_v34  ;;  %221 = vmatpush.msrb.mxu0 %v118_v37  ;;  %v53_v63 = vld [vmem:[%s830_s1 + $0x130] sm:$0xff]  ;;  %v110_v1 = vld [vmem:[%s830_s1 + $0x2f8] sm:$0xff]  ;;  %v32_v2 = vld [vmem:[%s830_s1 + $0x88] sm:$0xff]  ;;  %v416_v37 = vmov 0  }
  0x17   :  { %241 = vmatpush.msrb.mxu1 %v119_v39  ;;  %208 = vmatpush.msra.mxu3 %v40_v45  ;;  %v41_v0 = vld [vmem:[%s830_s1 + $0xd0] sm:$0xff]  ;;  %v42_v3 = vld [vmem:[%s830_s1 + $0xd8] sm:$0xff]  ;;  %v99_v5 = vld [vmem:[%s830_s1 + $0x2a0] sm:$0xff] }
  0x18   :  { %262 = vmatpush.msrb.mxu2 %v109_v38  ;;  %222 = vmatpush.msrb.mxu0 %v107_v40  ;;  %v30_v4 = vld [vmem:[%s830_s1 + $0x78] sm:$0xff]  ;;  %v21_v6 = vld [vmem:[%s830_s1 + $0x30] sm:$0xff]  ;;  %v31_v7 = vld [vmem:[%s830_s1 + $0x80] sm:$0xff] }
  0x19   :  { %242 = vmatpush.msrb.mxu1 %v108_v43  ;;  %209 = vmatpush.msra.mxu3 %v29_v49  ;;  %v124_v8 = vld [vmem:[%s830_s1 + $0x368] sm:$0xff]  ;;  %v19_v9 = vld [vmem:[%s830_s1 + $0x20] sm:$0xff]  ;;  %v113_v11 = vld [vmem:[%s830_s1 + $0x310] sm:$0xff] }
  0x1a   :  { %263 = vmatpush.msrb.mxu2 %v98_v42  ;;  %223 = vmatpush.msrb.mxu0 %v96_v44  ;;  %v20_v10 = vld [vmem:[%s830_s1 + $0x28] sm:$0xff]  ;;  %v122_v13 = vld [vmem:[%s830_s1 + $0x358] sm:$0xff]  ;;  %v123_v15 = vld [vmem:[%s830_s1 + $0x360] sm:$0xff] }
  0x1b   :  { %243 = vmatpush.msrb.mxu1 %v97_v47  ;;  %210 = vmatpush.msra.mxu3 %v18_v53  ;;  %v88_v12 = vld [vmem:[%s830_s1 + $0x248] sm:$0xff]  ;;  %v102_v14 = vld [vmem:[%s830_s1 + $0x2b8] sm:$0xff]  ;;  %v77_v16 = vld [vmem:[%s830_s1 + $0x1f0] sm:$0xff] }
  0x1c   :  { %264 = vmatpush.msrb.mxu2 %v87_v46  ;;  %224 = vmatpush.msrb.mxu0 %v85_v48  ;;  %v111_v17 = vld [vmem:[%s830_s1 + $0x300] sm:$0xff]  ;;  %v112_v19 = vld [vmem:[%s830_s1 + $0x308] sm:$0xff]  ;;  %v66_v20 = vld [vmem:[%s830_s1 + $0x198] sm:$0xff] }
  0x1d   :  { %244 = vmatpush.msrb.mxu1 %v86_v51  ;;  %383 = vmatmul.msk.f32.vlgmr.msra.gmra.mxu2 %vm131_vm0, %v611_v57  ;;  %v91_v18 = vld [vmem:[%s830_s1 + $0x260] sm:$0xff]  ;;  %v100_v21 = vld [vmem:[%s830_s1 + $0x2a8] sm:$0xff]  ;;  %v101_v23 = vld [vmem:[%s830_s1 + $0x2b0] sm:$0xff] }
  0x1e   :  { %265 = vmatpush.msrb.mxu2 %v76_v50  ;;  %225 = vmatpush.msrb.mxu0 %v74_v52  ;;  %v80_v22 = vld [vmem:[%s830_s1 + $0x208] sm:$0xff]  ;;  %v69_v24 = vld [vmem:[%s830_s1 + $0x1b0] sm:$0xff]  ;;  %v55_v25 = vld [vmem:[%s830_s1 + $0x140] sm:$0xff] }
  0x1f   :  { %245 = vmatpush.msrb.mxu1 %v75_v55  ;;  %281 = vmatpush.msrb.mxu3 %v121_v61  ;;  %v89_v26 = vld [vmem:[%s830_s1 + $0x250] sm:$0xff]  ;;  %v90_v27 = vld [vmem:[%s830_s1 + $0x258] sm:$0xff]  ;;  %v44_v29 = vld [vmem:[%s830_s1 + $0xe8] sm:$0xff] }
  0x20   :  { %266 = vmatpush.msrb.mxu2 %v65_v54  ;;  %226 = vmatpush.msrb.mxu0 %v63_v56  ;;  %v58_v28 = vld [vmem:[%s830_s1 + $0x158] sm:$0xff]  ;;  %v79_v31 = vld [vmem:[%s830_s1 + $0x200] sm:$0xff]  ;;  %v33_v33 = vld [vmem:[%s830_s1 + $0x90] sm:$0xff] }
  0x21   :  { %246 = vmatpush.msrb.mxu1 %v64_v59  ;;  %282 = vmatpush.msrb.mxu3 %v110_v1  ;;  %v78_v30 = vld [vmem:[%s830_s1 + $0x1f8] sm:$0xff]  ;;  %v47_v32 = vld [vmem:[%s830_s1 + $0x100] sm:$0xff]  ;;  %v68_v35 = vld [vmem:[%s830_s1 + $0x1a8] sm:$0xff] }
  0x22   :  { %267 = vmatpush.msrb.mxu2 %v54_v58  ;;  %227 = vmatpush.msrb.mxu0 %v52_v60  ;;  %v67_v34 = vld [vmem:[%s830_s1 + $0x1a0] sm:$0xff]  ;;  %v36_v36 = vld [vmem:[%s830_s1 + $0xa8] sm:$0xff]  ;;  %v22_v39 = vld [vmem:[%s830_s1 + $0x38] sm:$0xff] }
  0x23   :  { %247 = vmatpush.msrb.mxu1 %v53_v63  ;;  %283 = vmatpush.msrb.mxu3 %v99_v5  ;;  %v125_v38 = vld [vmem:[%s832_s2] sm:$0x7f]  ;;  %v56_v40 = vld [vmem:[%s830_s1 + $0x148] sm:$0xff]  ;;  %v57_v41 = vld [vmem:[%s830_s1 + $0x150] sm:$0xff] }
  0x24   :  { %268 = vmatpush.msrb.mxu2 %v43_v62  ;;  %228 = vmatpush.msrb.mxu0 %v41_v0  ;;  %v25_v42 = vld [vmem:[%s830_s1 + $0x50] sm:$0xff]  ;;  %v46_v44 = vld [vmem:[%s830_s1 + $0xf8] sm:$0xff]  ;;  %v35_v46 = vld [vmem:[%s830_s1 + $0xa0] sm:$0xff] }
  0x25   :  { %248 = vmatpush.msrb.mxu1 %v42_v3  ;;  %381 = vmatmul.msk.f32.vlgmr.msra.gmra.mxu0 %vm131_vm0, %v611_v57  ;;  %v45_v43 = vld [vmem:[%s830_s1 + $0xf0] sm:$0xff]  ;;  %v34_v45 = vld [vmem:[%s830_s1 + $0x98] sm:$0xff]  ;;  %v23_v47 = vld [vmem:[%s830_s1 + $0x40] sm:$0xff] }
  0x26   :  { %269 = vmatpush.msrb.mxu2 %v32_v2  ;;  %229 = vmatpush.msrb.mxu0 %v30_v4  ;;  %v24_v48 = vld [vmem:[%s830_s1 + $0x48] sm:$0xff] }
  0x27   :  { %249 = vmatpush.msrb.mxu1 %v31_v7  ;;  %284 = vmatpush.msrb.mxu3 %v88_v12 }
  0x28   :  { %270 = vmatpush.msrb.mxu2 %v21_v6  ;;  %230 = vmatpush.msrb.mxu0 %v19_v9 }
  0x29   :  { %250 = vmatpush.msrb.mxu1 %v20_v10  ;;  %285 = vmatpush.msrb.mxu3 %v77_v16 }
  0x2a   :  { %341 = vmatpush.msra.mxu2 %v124_v8  ;;  %382 = vmatmul.msk.f32.vlgmr.msra.gmra.mxu1 %vm131_vm0, %v611_v57 }
  0x2b   :  { %301 = vmatpush.msra.mxu0 %v122_v13  ;;  %321 = vmatpush.msra.mxu1 %v123_v15 }
  0x2c   :  { %342 = vmatpush.msra.mxu2 %v113_v11  ;;  %286 = vmatpush.msrb.mxu3 %v66_v20 }
  0x2d   :  { %302 = vmatpush.msra.mxu0 %v111_v17  ;;  %322 = vmatpush.msra.mxu1 %v112_v19 }
  0x2e   :  { %343 = vmatpush.msra.mxu2 %v102_v14  ;;  %384 = vmatmul.msk.f32.vlgmr.msra.gmra.mxu3 %vm131_vm0, %v611_v57 }
  0x2f   :  { %303 = vmatpush.msra.mxu0 %v100_v21  ;;  %323 = vmatpush.msra.mxu1 %v101_v23 }
  0x30   :  { %344 = vmatpush.msra.mxu2 %v91_v18  ;;  %287 = vmatpush.msrb.mxu3 %v55_v25 }
  0x31   :  { %387 = vmatmul.msk.f32.vlgmr.msrb.gmra.mxu2 %vm131_vm0, %v611_v57  ;;  %304 = vmatpush.msra.mxu0 %v89_v26 }
  0x32   :  { %345 = vmatpush.msra.mxu2 %v80_v22  ;;  %324 = vmatpush.msra.mxu1 %v90_v27 }
  0x33   :  { %288 = vmatpush.msrb.mxu3 %v44_v29  ;;  %305 = vmatpush.msra.mxu0 %v78_v30 }
  0x34   :  { %346 = vmatpush.msra.mxu2 %v69_v24  ;;  %325 = vmatpush.msra.mxu1 %v79_v31 }
  0x35   :  { %393 = vset.pattern.permute.xlu0 %v416_v37  ;;  %289 = vmatpush.msrb.mxu3 %v33_v33 }
  0x36   :  { %347 = vmatpush.msra.mxu2 %v58_v28  ;;  %306 = vmatpush.msra.mxu0 %v67_v34 }
  0x37   :  { %326 = vmatpush.msra.mxu1 %v68_v35  ;;  %128 = vperm.xlu0 %393, %v125_v38  }
  0x38   :  { %348 = vmatpush.msra.mxu2 %v47_v32  ;;  %385 = vmatmul.msk.f32.vlgmr.msrb.gmra.mxu0 %vm131_vm0, %v611_v57 }
  0x39   :  { %386 = vmatmul.msk.f32.vlgmr.msrb.gmra.mxu1 %vm131_vm0, %v611_v57  ;;  %290 = vmatpush.msrb.mxu3 %v22_v39 }
  0x3a   :  { %349 = vmatpush.msra.mxu2 %v36_v36  ;;  %307 = vmatpush.msra.mxu0 %v56_v40 }
  0x3b   :  { %327 = vmatpush.msra.mxu1 %v57_v41  ;;  %388 = vmatmul.msk.f32.vlgmr.msrb.gmra.mxu3 %vm131_vm0, %v611_v57 }
  0x3c   :  { %350 = vmatpush.msra.mxu2 %v25_v42  ;;  %308 = vmatpush.msra.mxu0 %v45_v43 }
  0x3d   :  { %391 = vmatmul.msk.f32.vlgmr.msra.gmra.mxu2 %vm131_vm0, %v611_v57  ;;  %328 = vmatpush.msra.mxu1 %v46_v44 }
  0x3e   :  { %309 = vmatpush.msra.mxu0 %v34_v45 }
  0x3f   :  { %329 = vmatpush.msra.mxu1 %v35_v46 }
  0x40   :  { %310 = vmatpush.msra.mxu0 %v23_v47 }
  0x41   :  { %330 = vmatpush.msra.mxu1 %v24_v48  ;;  %389 = vmatmul.msk.f32.vlgmr.msra.gmra.mxu0 %vm131_vm0, %v611_v57 }
  0x42   :  { %390 = vmatmul.msk.f32.vlgmr.msra.gmra.mxu1 %vm131_vm0, %v611_v57 }
  0xa0   :  { %v192_v49 = vpop.f32.mrf.mxu2 }
  0xa2   :  { %v152_v50 = vpop.f32.mrf.mxu0 }
  0xa7   :  { %v172_v51 = vpop.f32.mrf.mxu1 }
  0xa9   :  { %v129_v52 = vpop.permute.xlu0 %128 }
  0xaa   :  { %v153_v53 = vadd.f32 %v152_v50, %v129_v52  ;;  %v173_v54 = vadd.f32 %v172_v51, %v129_v52  ;;  %v193_v55 = vadd.f32 %v192_v49, %v129_v52 }
  0xac   :  { %394 = vtanh.f32 %v153_v53 }
  0xad   :  { %396 = vtanh.f32 %v173_v54 }
  0xae   :  { %398 = vtanh.f32 %v193_v55 }
  0xb1   :  { %v212_v58 = vpop.f32.mrf.mxu3 }
  0xb2   :  { %v395_v56 = vpop.eup %394  ;;  %v213_v61 = vadd.f32 %v212_v58, %v129_v52 }
  0xb3   :  { %v397_v60 = vpop.eup %396  ;;  %366 = vst [vmem:[%s833_s3] sm:$0x7f] %v395_v56 }
  0xb4   :  { %v272_v59 = vpop.f32.mrf.mxu2  ;;  %v399_v62 = vpop.eup %398  ;;  %367 = vst [vmem:[%s833_s3 + $0x8] sm:$0x7f] %v397_v60  ;;  %400 = vtanh.f32 %v213_v61 }
  0xb5   :  { %v273_v57 = vadd.f32 %v272_v59, %v129_v52  ;;  %v232_v63 = vpop.f32.mrf.mxu0  ;;  %368 = vst [vmem:[%s833_s3 + $0x10] sm:$0x7f] %v399_v62 }
  0xb6   :  { %v233_v0 = vadd.f32 %v232_v63, %v129_v52  ;;  %v252_v1 = vpop.f32.mrf.mxu1 }
  0xb7   :  { %v253_v2 = vadd.f32 %v252_v1, %v129_v52  ;;  %402 = vtanh.f32 %v273_v57 }
  0xb8   :  { %404 = vtanh.f32 %v233_v0 }
  0xb9   :  { %406 = vtanh.f32 %v253_v2 }
  0xba   :  { %v401_v3 = vpop.eup %400 }
  0xbb   :  { %369 = vst [vmem:[%s833_s3 + $0x18] sm:$0x7f] %v401_v3 }
  0xbd   :  { %v403_v4 = vpop.eup %402 }
  0xbe   :  { %v405_v5 = vpop.eup %404  ;;  %372 = vst [vmem:[%s833_s3 + $0x30] sm:$0x7f] %v403_v4  ;;  %v292_v6 = vpop.f32.mrf.mxu3 }
  0xbf   :  { %v312_v7 = vpop.f32.mrf.mxu0  ;;  %v407_v8 = vpop.eup %406  ;;  %370 = vst [vmem:[%s833_s3 + $0x20] sm:$0x7f] %v405_v5  ;;  %v293_v9 = vadd.f32 %v292_v6, %v129_v52 }
  0xc0   :  { %v313_v10 = vadd.f32 %v312_v7, %v129_v52  ;;  %v332_v11 = vpop.f32.mrf.mxu1  ;;  %v352_v12 = vpop.f32.mrf.mxu2  ;;  %371 = vst [vmem:[%s833_s3 + $0x28] sm:$0x7f] %v407_v8 }
  0xc1   :  { %v333_v13 = vadd.f32 %v332_v11, %v129_v52  ;;  %v353_v14 = vadd.f32 %v352_v12, %v129_v52  ;;  %408 = vtanh.f32 %v293_v9 }
  0xc2   :  { %410 = vtanh.f32 %v313_v10 }
  0xc3   :  { %412 = vtanh.f32 %v333_v13 }
  0xc4   :  { %414 = vtanh.f32 %v353_v14 }
  0xc7   :  { %v409_v15 = vpop.eup %408 }
  0xc8   :  { %v411_v16 = vpop.eup %410  ;;  %373 = vst [vmem:[%s833_s3 + $0x38] sm:$0x7f] %v409_v15 }
  0xc9   :  { %v413_v17 = vpop.eup %412  ;;  %374 = vst [vmem:[%s833_s3 + $0x40] sm:$0x7f] %v411_v16 }
  0xca   :  { %v415_v18 = vpop.eup %414  ;;  %375 = vst [vmem:[%s833_s3 + $0x48] sm:$0x7f] %v413_v17 }
  0xcb   :  { %376 = vst [vmem:[%s833_s3 + $0x50] sm:$0x7f] %v415_v18 }

</bundles_post_ra>
